<compile_context>
chip_gen: v7x
topology: tpu7x:2x2x1
jax: 0.10.0
libtpu: 0.0.40
codegen_flags: <defaults>
</compile_context>

<pallas_src>
import functools

import jax
import jax.numpy as jnp
from jax import lax
from jax.experimental import pallas as pl
from jax.experimental.pallas import tpu as pltpu

MARGIN = 1.0


def _hinge_partial_kernel(x_ref, t_ref, psum_ref, *, n_valid, tm, lanes,
                          needs_mask):
    # Elementwise hot path in f32 (upcast in-register; HBM traffic stays in
    # the input dtype).
    x = x_ref[...].astype(jnp.float32)
    t = t_ref[...].astype(jnp.float32)
    hinge = jnp.maximum(MARGIN - x * t, 0.0)

    if needs_mask:
        # Zero-padding is not neutral (relu(1 - 0) = 1): mask padded tail.
        i = pl.program_id(0)
        row = lax.broadcasted_iota(jnp.int32, (tm, lanes), 0)
        col = lax.broadcasted_iota(jnp.int32, (tm, lanes), 1)
        flat = (i * tm + row) * lanes + col
        hinge = jnp.where(flat < n_valid, hinge, 0.0)

    # One partial sum per tile (XLU reduce; scalar lands in SMEM).
    psum_ref[0, 0] = jnp.sum(hinge)


def _round_up(a, b):
    return ((a + b - 1) // b) * b


def hinge_loss(x, target):
    """Pallas implementation of HingeLoss.forward(input, target) -> scalar."""
    assert x.shape == target.shape, "input/target shapes must match"
    n = int(x.size)
    xf = x.reshape(-1)
    tf = target.reshape(-1)

    # Lane-dense layout: last dim a large multiple of 128.
    lanes = 1024 if n >= 1024 else 128
    rows = _round_up(n, lanes) // lanes
    # Tile rows: multiple of 8, capped so a tile is <= 512*1024*4B = 2 MiB.
    tm = min(512, _round_up(rows, 8))
    rows_padded = _round_up(rows, tm)
    padded_n = rows_padded * lanes

    if padded_n != n:
        xf = jnp.pad(xf, (0, padded_n - n))
        tf = jnp.pad(tf, (0, padded_n - n))
    x2 = xf.reshape(rows_padded, lanes)
    t2 = tf.reshape(rows_padded, lanes)

    num_tiles = rows_padded // tm
    needs_mask = padded_n != n

    kernel = functools.partial(
        _hinge_partial_kernel,
        n_valid=n, tm=tm, lanes=lanes, needs_mask=needs_mask)

    partials = pl.pallas_call(
        kernel,
        out_shape=jax.ShapeDtypeStruct((num_tiles, 1), jnp.float32),
        grid=(num_tiles,),
        in_specs=[
            pl.BlockSpec((tm, lanes), lambda i: (i, 0)),
            pl.BlockSpec((tm, lanes), lambda i: (i, 0)),
        ],
        out_specs=pl.BlockSpec((1, 1), lambda i: (i, 0),
                               memory_space=pltpu.SMEM),
        compiler_params=pltpu.CompilerParams(
            dimension_semantics=("parallel",)),
    )(x2, t2)

    # Final tiny reduction + true-count mean in the wrapper.
    return jnp.sum(partials) / jnp.float32(n)


if __name__ == "__main__":
    key = jax.random.PRNGKey(0)
    k1, k2, k3, k4 = jax.random.split(key, 4)

    # Case 1: classifier-style small shape (batch=8, num_classes=32).
    x = jax.random.normal(k1, (8, 32), dtype=jnp.float32)
    target = jnp.where(
        jax.random.bernoulli(k2, 0.5, (8, 32)), 1.0, -1.0
    ).astype(jnp.float32)

    loss = hinge_loss(x, target)
    jax.block_until_ready(loss)
    ref = jnp.mean(jnp.maximum(MARGIN - x * target, 0.0))
    assert jnp.allclose(loss, ref, rtol=1e-5, atol=1e-6), (loss, ref)

    # Case 2: exercises the lane-dense (1024-lane) tiled path with masking.
    x2 = jax.random.normal(k3, (16, 384), dtype=jnp.float32)
    t2 = jnp.where(
        jax.random.bernoulli(k4, 0.5, (16, 384)), 1.0, -1.0
    ).astype(jnp.float32)

    loss2 = hinge_loss(x2, t2)
    jax.block_until_ready(loss2)
    ref2 = jnp.mean(jnp.maximum(MARGIN - x2 * t2, 0.0))
    assert jnp.allclose(loss2, ref2, rtol=1e-5, atol=1e-6), (loss2, ref2)

    print("KERNEL_OK")
</pallas_src>

<mosaic_0001>
module attributes {stable_mosaic.version = 11 : i64} {
  func.func @_hinge_partial_kernel(%arg0: i32, %arg1: memref<8x128xf32, #tpu.memory_space<vmem>>, %arg2: memref<8x128xf32, #tpu.memory_space<vmem>>, %arg3: memref<1x1xf32, #tpu.memory_space<smem>>) attributes {dimension_semantics = [#tpu.dimension_semantics<parallel>], iteration_bounds = array<i64: 1>, scalar_prefetch = 0 : i64, scratch_operands = 0 : i64, tpu.core_type = #tpu.core_type<tc>, window_params = [{transform_indices = @transform_0, window_bounds = array<i64: 8, 128>}, {transform_indices = @transform_1, window_bounds = array<i64: 8, 128>}, {transform_indices = @transform_2, window_bounds = array<i64: 1, 1>}]} {
    %c0 = arith.constant 0 : index
    %c0_0 = arith.constant 0 : index
    %0 = vector.load %arg1[%c0, %c0_0] : memref<8x128xf32, #tpu.memory_space<vmem>>, vector<8x128xf32>
    %c0_1 = arith.constant 0 : index
    %c0_2 = arith.constant 0 : index
    %1 = vector.load %arg2[%c0_1, %c0_2] : memref<8x128xf32, #tpu.memory_space<vmem>>, vector<8x128xf32>
    %2 = arith.mulf %0, %1 : vector<8x128xf32>
    %cst = arith.constant 1.000000e+00 : f32
    %3 = vector.broadcast %cst : f32 to vector<8x128xf32>
    %4 = arith.subf %3, %2 : vector<8x128xf32>
    %cst_3 = arith.constant 0.000000e+00 : f32
    %5 = vector.broadcast %cst_3 : f32 to vector<8x128xf32>
    %6 = arith.maximumf %4, %5 : vector<8x128xf32>
    %7 = tpu.iota {dimensions = array<i32: 0>} : vector<8x128xi32>
    %8 = tpu.iota {dimensions = array<i32: 1>} : vector<8x128xi32>
    %c8_i32 = arith.constant 8 : i32
    %9 = arith.muli %arg0, %c8_i32 : i32
    %10 = vector.broadcast %9 : i32 to vector<8x128xi32>
    %11 = arith.addi %10, %7 : vector<8x128xi32>
    %c128_i32 = arith.constant 128 : i32
    %12 = vector.broadcast %c128_i32 : i32 to vector<8x128xi32>
    %13 = arith.muli %11, %12 : vector<8x128xi32>
    %14 = arith.addi %13, %8 : vector<8x128xi32>
    %c256_i32 = arith.constant 256 : i32
    %15 = vector.broadcast %c256_i32 : i32 to vector<8x128xi32>
    %16 = arith.cmpi slt, %14, %15 : vector<8x128xi32>
    %cst_4 = arith.constant 0.000000e+00 : f32
    %17 = vector.broadcast %cst_4 : f32 to vector<8x128xf32>
    %18 = arith.select %16, %6, %17 : vector<8x128xi1>, vector<8x128xf32>
    %19 = vector.shape_cast %18 : vector<8x128xf32> to vector<1x8x128xf32>
    %cst_5 = arith.constant dense<0.000000e+00> : vector<1xf32>
    %20 = vector.multi_reduction <add>, %19, %cst_5 [1, 2] : vector<1x8x128xf32> to vector<1xf32>
    %21 = vector.shape_cast %20 : vector<1xf32> to vector<1x1x1xf32>
    %22 = vector.extract %21[0, 0, 0] : f32 from vector<1x1x1xf32>
    %c0_6 = arith.constant 0 : index
    %c0_7 = arith.constant 0 : index
    %23 = memref.load %arg3[%c0_6, %c0_7] : memref<1x1xf32, #tpu.memory_space<smem>>
    memref.store %22, %arg3[%c0_6, %c0_7] : memref<1x1xf32, #tpu.memory_space<smem>>
    return
  }
  func.func @transform_0(%arg0: i32) -> (i32, i32) {
    %c0_i32 = arith.constant 0 : i32
    %c0_i32_0 = arith.constant 0 : i32
    return %arg0, %c0_i32 : i32, i32
  }
  func.func @transform_1(%arg0: i32) -> (i32, i32) {
    %c0_i32 = arith.constant 0 : i32
    %c0_i32_0 = arith.constant 0 : i32
    return %arg0, %c0_i32 : i32, i32
  }
  func.func @transform_2(%arg0: i32) -> (i32, i32) {
    %c0_i32 = arith.constant 0 : i32
    %c0_i32_0 = arith.constant 0 : i32
    return %arg0, %c0_i32 : i32, i32
  }
}

</mosaic_0001>

<bundles_post_ra>
// kernel: tpu_custom_call.1
= control target key start
LH: loop header
LB: loop body
LE: loop exit
PB: predicated region body
PF: predicated region fallthrough
CT: control target
= control target key end

     0   :  { %7 = vsyncpa [#allocation3], 0  ;;  %s197_s0 = inlined_call_operand.hbm [shape: f32[8,128], index: 0, kind: input, shape index: {}]   ;;  %s198_s1 = inlined_call_operand.hbm [shape: f32[8,128], index: 1, kind: input, shape index: {}]   ;;  %s199_s2 = inlined_call_operand.hbm [shape: f32[1,1], index: 2, kind: output, shape index: {}]  }
   0x1   :  { %8 = vsyncpa [#allocation6], 0 }
   0x2   :  { %9 = vsyncpa [#allocation4], 0  ;;  %s143_s9 = smov [#allocation2]   ;;  %s144_s11 = smov [#allocation5]  }
   0x3   :  { %s16_s10 = sshll.u32 %s143_s9, 4  ;;  %s26_s12 = sshll.u32 %s144_s11, 4  ;;  %s17_s10 = int_to_ptr.vmem [resolvable:$true] %s16_s10  ;;  %s27_s12 = int_to_ptr.vmem [resolvable:$true] %s26_s12 }
   0x4   :  { %s83_s15 = scalar_lea.hbm %s197_s0, 128 }
   0x5   :  { %p84_p0 = scmp.ne.s32.totalorder %s197_s0, %s83_s15  ;;  %p87_p1 = scmp.lt.u32.totalorder %s83_s15, %s197_s0 }
   0x7   :  { %p89_p2 = pnand %p87_p1, %p84_p0 }
   0x9   :  { %92 = shalt.err (!%p89_p2)
}
   0xa   :  { %s93_s20 = scalar_lea.vmem %s17_s10, 128  ;;  %p98_p4 = scmp.lt.s32.totalorder %s17_s10, %s17_s10 }
   0xb   :  { %p94_p3 = scmp.ne.s32.totalorder %s17_s10, %s93_s20  ;;  %p99_p5 = scmp.lt.s32.totalorder %s93_s20, %s93_s20 }
   0xd   :  { %p100_p6 = por %p99_p5, %p98_p4 }
   0xf   :  { %p101_p7 = pnand %p100_p6, %p94_p3 }
  0x11   :  { %104 = shalt.err (!%p101_p7)
}
  0x12   :  { %19 = dma.hbm_to_vmem [thread:$0]  %s197_s0, 128, %s17_s10, [#allocation3]  }
  0x13   :  { %s105_s25 = scalar_lea.hbm %s198_s1, 128 }
  0x14   :  { %p106_p8 = scmp.ne.s32.totalorder %s198_s1, %s105_s25  ;;  %p109_p9 = scmp.lt.u32.totalorder %s105_s25, %s198_s1 }
  0x16   :  { %p111_p10 = pnand %p109_p9, %p106_p8 }
  0x18   :  { %114 = shalt.err (!%p111_p10)
}
  0x19   :  { %s115_s30 = scalar_lea.vmem %s27_s12, 128  ;;  %p120_p12 = scmp.lt.s32.totalorder %s27_s12, %s27_s12 }
  0x1a   :  { %p116_p11 = scmp.ne.s32.totalorder %s27_s12, %s115_s30  ;;  %p121_p13 = scmp.lt.s32.totalorder %s115_s30, %s115_s30 }
  0x1c   :  { %p122_p0 = por %p121_p13, %p120_p12 }
  0x1e   :  { %p123_p1 = pnand %p122_p0, %p116_p11 }
  0x20   :  { %126 = shalt.err (!%p123_p1)
}
  0x21   :  { %29 = dma.hbm_to_vmem [thread:$0]  %s198_s1, 128, %s27_s12, [#allocation6]  }
  0x22   :  { %137 = dma.done.wait [#allocation3], 128  }
  0x23   :  { %138 = vsyncadd [#allocation3], 4294967168 }
  0x24   :  { %139 = dma.done.wait [#allocation6], 128  }
  0x25   :  { %140 = vsyncadd [#allocation6], 4294967168  ;;  %v41_v0 = vlaneseq  ;;  %v36_v4 = vld [vmem:[#allocation2] sm:$0xff]  ;;  %v37_v5 = vld [vmem:[#allocation5] sm:$0xff]  ;;  %s127_s6 = scalar_lea.hbm %s199_s2, 16 }
  0x26   :  { %v38_v7 = vmul.f32 %v37_v5, %v36_v4  ;;  %p128_p2 = scmp.ne.s32.totalorder %s199_s2, %s127_s6  ;;  %p131_p3 = scmp.lt.u32.totalorder %s127_s6, %s199_s2 }
  0x27   :  { %v42_v1 = vshrl.u32 %v41_v0, 7  ;;  %v44_v2 = vand.u32 127, %v41_v0 }
  0x28   :  { %v39_v8 = vsub.f32 1.0, %v38_v7  ;;  %p133_p4 = pnand %p131_p3, %p128_p2 }
  0x29   :  { %v48_v3 = vmul.u32 128, %v42_v1 }
  0x2a   :  { %v40_v9 = vmax.f32 %v39_v8, 0.0 }
  0x2b   :  { %v49_v6 = vadd.s32 %v48_v3, %v44_v2 }
  0x2d   :  { %vm50_vm0 = vcmp.lt.s32.totalorder %v49_v6, 256 }
  0x2e   :  { %v51_v10 = vsel %vm50_vm0, %v40_v9, 0.0 }
  0x2f   :  { %52 = vadd.xlane.f32.xlu0 %v51_v10 }
  0xbc   :  { %v53_v11 = vpop.xlane.xlu0 %52 }
  0xbd   :  { %v54_v12 = vrot.slane %v53_v11, 4 }
  0xbf   :  { %v55_v13 = vadd.f32 %v54_v12, %v53_v11 }
  0xc1   :  { %v56_v14 = vrot.slane %v55_v13, 2 }
  0xc3   :  { %v57_v15 = vadd.f32 %v56_v14, %v55_v13 }
  0xc5   :  { %v58_v16 = vrot.slane %v57_v15, 1 }
  0xc7   :  { %v59_v17 = vadd.f32 %v58_v16, %v57_v15 }
  0xc9   :  { %78 = vpush %v59_v17 }
  0xfa   :  { %s79_s1 = spop %78 }
  0xfb   :  { %62 = sst [smem:[#allocation7]] %s79_s1 }
  0xfc   :  { %136 = shalt.err (!%p133_p4)
}
  0xfd   :  { %s145_s11 = smov [#allocation7]  }
  0xfe   :  { %70 = dma.smem_to_hbm %s145_s11, 16, %s199_s2, [#allocation4]  }
  0xff   :  { %141 = dma.done.wait [#allocation4], 16  }
 0x100   :  { %142 = vsyncadd [#allocation4], 4294967280 }
 0x101   :  { %74 = sfence }
 0x102   :  { %75 = vsyncpa [#allocation3], 1 }
 0x103   :  { %76 = vsyncpa [#allocation6], 1 }
 0x104   :  { %77 = vsyncpa [#allocation4], 1 }

</bundles_post_ra>
